<compile_context>
chip_gen: v6e
topology: v6e:2x2x1
jax: 0.10.0
libtpu: 0.0.40
codegen_flags: <defaults>
</compile_context>

<pallas_src>
import jax
import jax.numpy as jnp
from jax.experimental import pallas as pl
from jax.experimental.pallas import tpu as pltpu


_SQRT_HALF = 0.70710678118654752440


def _gelu_exact(v):
    # PyTorch nn.GELU() default: exact erf-based GELU, computed in fp32.
    return 0.5 * v * (1.0 + jax.lax.erf(v * jnp.float32(_SQRT_HALF)))


def mlp_kernel(x_ref, w1_ref, b1_ref, w2_ref, b2_ref, w3_ref, b3_ref, o_ref):
    # x / weights arrive in bf16; every dot accumulates in fp32 on the MXU.
    x = x_ref[...]

    h = jnp.dot(x, w1_ref[...], preferred_element_type=jnp.float32) + b1_ref[...]
    h = _gelu_exact(h)

    h = jnp.dot(h.astype(jnp.bfloat16), w2_ref[...],
                preferred_element_type=jnp.float32) + b2_ref[...]
    h = _gelu_exact(h)

    h = jnp.dot(h.astype(jnp.bfloat16), w3_ref[...],
                preferred_element_type=jnp.float32) + b3_ref[...]
    h = _gelu_exact(h)

    o_ref[...] = h.astype(o_ref.dtype)


def _round_up(x, m):
    return (x + m - 1) // m * m


def _pad2d(a, rows, cols):
    r, c = a.shape
    if r == rows and c == cols:
        return a
    return jnp.pad(a, ((0, rows - r), (0, cols - c)))


def _vmem_capacity_bytes():
    # Trace-time hardware query; fall back to the 128 MiB (v5e/v6e) assumption.
    try:
        info = pltpu.get_tpu_info()
        for name in ("vmem_capacity_bytes", "vmem_bytes", "vmem_size_bytes"):
            v = getattr(info, name, None)
            if v:
                return int(v)
    except Exception:
        pass
    return 128 * 1024 * 1024


def _pick_tm(B, vmem_cap_bytes):
    # Pick the batch tile FIRST, then pad the batch up to a multiple of it.
    #  - multiples of 128 keep the MXU's M dimension full,
    #  - cap at 256 on 64 MiB/TC parts (v7x): fp32 intermediates + resident weights
    #    fit, and the "parallel" grid gets >=2 blocks for the 2 TensorCores,
    #  - cap at 512 on 128 MiB parts (v5e/v6e).
    cap = 256 if vmem_cap_bytes <= (64 << 20) else 512
    if B <= 128:
        return _round_up(B, 8)        # single small tile, no wasted rows beyond sublane
    if B <= cap:
        return _round_up(B, 128)      # single lane/MXU-aligned tile
    return cap                        # many tiles; batch padded to a multiple of cap


def _resident_spec(shape):
    # Constant-index (weight / bias) blocks are never re-fetched across the grid:
    # request a single VMEM buffer instead of the default double-buffering.
    try:
        return pl.BlockSpec(shape, lambda i: (0, 0), pipeline_mode=pl.Buffered(1))
    except TypeError:  # older BlockSpec without pipeline_mode
        return pl.BlockSpec(shape, lambda i: (0, 0))


@jax.jit
def mlp_forward(x, w1, b1, w2, b2, w3, b3):
    B, D_in = x.shape
    D1 = w1.shape[1]   # latent_dim * 2
    D2 = w2.shape[1]   # latent_dim
    D3 = w3.shape[1]   # latent_dim

    # Lane-dense padding of every feature dim (multiple of 128).
    Din_p = _round_up(D_in, 128)
    D1_p = _round_up(D1, 128)
    D2_p = _round_up(D2, 128)
    D3_p = _round_up(D3, 128)

    vmem_cap = _vmem_capacity_bytes()
    tm = _pick_tm(B, vmem_cap)
    Bp = _round_up(B, tm)             # batch padded to a multiple of tm (cheap zero rows)
    grid = (Bp // tm,)

    # Zero-pad; correctness preserved since GELU(0) = 0 and padded rows/cols are 0.
    xp = _pad2d(x, Bp, Din_p).astype(jnp.bfloat16)
    w1p = _pad2d(w1, Din_p, D1_p).astype(jnp.bfloat16)
    w2p = _pad2d(w2, D1_p, D2_p).astype(jnp.bfloat16)
    w3p = _pad2d(w3, D2_p, D3_p).astype(jnp.bfloat16)
    b1p = _pad2d(b1, 1, D1_p).astype(jnp.float32)
    b2p = _pad2d(b2, 1, D2_p).astype(jnp.float32)
    b3p = _pad2d(b3, 1, D3_p).astype(jnp.float32)

    # VMEM budget from actual tile sizes:
    #   single-buffered weights/biases + double-buffered x/out tiles + fp32 activations.
    weight_bytes = 2 * (Din_p * D1_p + D1_p * D2_p + D2_p * D3_p)
    bias_bytes = 4 * (D1_p + D2_p + D3_p)
    io_bytes = 2 * tm * Din_p * 2 + 2 * tm * D3_p * 4
    act_bytes = 3 * tm * max(D1_p, D2_p, D3_p) * 4
    needed = weight_bytes + bias_bytes + io_bytes + act_bytes
    vmem_ceiling = vmem_cap - (8 << 20)        # ~56 MiB on v7x, ~120 MiB on v5e/v6e
    vmem_limit = int(min(max(needed * 5 // 4 + (2 << 20), 32 << 20), vmem_ceiling))

    flops = 2 * Bp * (Din_p * D1_p + D1_p * D2_p + D2_p * D3_p)
    transcendentals = Bp * (D1_p + D2_p + D3_p)
    bytes_accessed = (
        Bp * Din_p * 2
        + (Din_p * D1_p + D1_p * D2_p + D2_p * D3_p) * 2
        + (D1_p + D2_p + D3_p) * 4
        + Bp * D3_p * 4
    )

    out_p = pl.pallas_call(
        mlp_kernel,
        out_shape=jax.ShapeDtypeStruct((Bp, D3_p), x.dtype),
        grid_spec=pltpu.PrefetchScalarGridSpec(
            num_scalar_prefetch=0,
            grid=grid,
            in_specs=[
                pl.BlockSpec((tm, Din_p), lambda i: (i, 0)),   # x tile (double-buffered)
                _resident_spec((Din_p, D1_p)),                 # W1 (single-buffered)
                _resident_spec((1, D1_p)),                     # b1
                _resident_spec((D1_p, D2_p)),                  # W2
                _resident_spec((1, D2_p)),                     # b2
                _resident_spec((D2_p, D3_p)),                  # W3
                _resident_spec((1, D3_p)),                     # b3
            ],
            out_specs=pl.BlockSpec((tm, D3_p), lambda i: (i, 0)),
        ),
        compiler_params=pltpu.CompilerParams(
            dimension_semantics=("parallel",),
            vmem_limit_bytes=vmem_limit,
        ),
        cost_estimate=pl.CostEstimate(
            flops=flops,
            transcendentals=transcendentals,
            bytes_accessed=bytes_accessed,
        ),
    )(xp, w1p, b1p, w2p, b2p, w3p, b3p)

    # TODO(synk): for latent_dim >= ~1024 on v7x (64 MiB VMEM/TC) the three resident
    # bf16 weights no longer fit even single-buffered; add a K/N weight-tiling grid
    # axis (or split into per-layer pallas_calls) instead of keeping them resident.
    return out_p[:B, :D3]


def init_params(key, latent_dim):
    """Deterministic synthetic params matching nn.Linear shapes (stored transposed)."""
    d2, d1 = latent_dim * 2, latent_dim
    keys = jax.random.split(key, 6)

    def linear(kw, kb, fan_in, fan_out):
        bound = 1.0 / jnp.sqrt(fan_in)
        w = jax.random.uniform(kw, (fan_in, fan_out), jnp.float32, -bound, bound)
        b = jax.random.uniform(kb, (1, fan_out), jnp.float32, -bound, bound)
        return w, b

    w1, b1 = linear(keys[0], keys[1], d2, d2)   # in_lin:     2L -> 2L
    w2, b2 = linear(keys[2], keys[3], d2, d1)   # hidden_lin: 2L -> L
    w3, b3 = linear(keys[4], keys[5], d1, d1)   # out_lin:    L  -> L
    return w1, b1, w2, b2, w3, b3


def mlp_reference(x, w1, b1, w2, b2, w3, b3):
    g = lambda v: 0.5 * v * (1.0 + jax.lax.erf(v / jnp.sqrt(2.0)))
    h = g(x @ w1 + b1)
    h = g(h @ w2 + b2)
    h = g(h @ w3 + b3)
    return h


if __name__ == "__main__":
    latent_dim = 64          # small, consistent with the module (2L=128 input features)
    batch = 8

    key = jax.random.PRNGKey(0)
    kx, kp = jax.random.split(key)
    x = jax.random.normal(kx, (batch, latent_dim * 2), jnp.float32)
    params = init_params(kp, latent_dim)

    out = mlp_forward(x, *params)
    out = jax.block_until_ready(out)

    ref = mlp_reference(x, *params)
    assert out.shape == (batch, latent_dim)
    # bf16 MXU operands (fp32 accumulation) -> looser tolerance than pure fp32.
    assert jnp.allclose(out, ref, atol=3e-2, rtol=3e-2), "mismatch vs JAX reference"

    print("KERNEL_OK")
</pallas_src>

<mosaic_0001>
module attributes {stable_mosaic.version = 11 : i64} {
  func.func @mlp_kernel(%arg0: i32, %arg1: memref<8x128xbf16, #tpu.memory_space<vmem>>, %arg2: memref<128x128xbf16, #tpu.memory_space<vmem>>, %arg3: memref<1x128xf32, #tpu.memory_space<vmem>>, %arg4: memref<128x128xbf16, #tpu.memory_space<vmem>>, %arg5: memref<1x128xf32, #tpu.memory_space<vmem>>, %arg6: memref<128x128xbf16, #tpu.memory_space<vmem>>, %arg7: memref<1x128xf32, #tpu.memory_space<vmem>>, %arg8: memref<8x128xf32, #tpu.memory_space<vmem>>) attributes {dimension_semantics = [#tpu.dimension_semantics<parallel>], iteration_bounds = array<i64: 1>, scalar_prefetch = 0 : i64, scratch_operands = 0 : i64, tpu.core_type = #tpu.core_type<tc>, window_params = [{transform_indices = @transform_0, window_bounds = array<i64: 8, 128>}, {pipeline_mode = #tpu.pipeline_mode<synchronous>, transform_indices = @transform_1, window_bounds = array<i64: 128, 128>}, {pipeline_mode = #tpu.pipeline_mode<synchronous>, transform_indices = @transform_2, window_bounds = array<i64: 1, 128>}, {pipeline_mode = #tpu.pipeline_mode<synchronous>, transform_indices = @transform_3, window_bounds = array<i64: 128, 128>}, {pipeline_mode = #tpu.pipeline_mode<synchronous>, transform_indices = @transform_4, window_bounds = array<i64: 1, 128>}, {pipeline_mode = #tpu.pipeline_mode<synchronous>, transform_indices = @transform_5, window_bounds = array<i64: 128, 128>}, {pipeline_mode = #tpu.pipeline_mode<synchronous>, transform_indices = @transform_6, window_bounds = array<i64: 1, 128>}, {transform_indices = @transform_7, window_bounds = array<i64: 8, 128>}]} {
    %c0 = arith.constant 0 : index
    %c0_0 = arith.constant 0 : index
    %0 = vector.load %arg1[%c0, %c0_0] : memref<8x128xbf16, #tpu.memory_space<vmem>>, vector<8x128xbf16>
    %c0_1 = arith.constant 0 : index
    %c0_2 = arith.constant 0 : index
    %1 = vector.load %arg2[%c0_1, %c0_2] : memref<128x128xbf16, #tpu.memory_space<vmem>>, vector<128x128xbf16>
    %cst = arith.constant dense<0.000000e+00> : vector<8x128xf32>
    %2 = tpu.matmul %0, %1, %cst {dimension_numbers = #tpu.dot_dimension_numbers<[1], [0], [0], [1], [0, 0, 1, 1], [], []>} : vector<8x128xbf16>, vector<128x128xbf16>, vector<8x128xf32> -> vector<8x128xf32>
    %c0_3 = arith.constant 0 : index
    %c0_4 = arith.constant 0 : index
    %3 = vector.load %arg3[%c0_3, %c0_4] : memref<1x128xf32, #tpu.memory_space<vmem>>, vector<1x128xf32>
    %4 = vector.broadcast %3 : vector<1x128xf32> to vector<8x128xf32>
    %5 = arith.addf %2, %4 : vector<8x128xf32>
    %cst_5 = arith.constant 5.000000e-01 : f32
    %6 = vector.broadcast %cst_5 : f32 to vector<8x128xf32>
    %7 = arith.mulf %6, %5 : vector<8x128xf32>
    %cst_6 = arith.constant 0.707106769 : f32
    %8 = vector.broadcast %cst_6 : f32 to vector<8x128xf32>
    %9 = arith.mulf %5, %8 : vector<8x128xf32>
    %10 = math.erf %9 : vector<8x128xf32>
    %cst_7 = arith.constant 1.000000e+00 : f32
    %11 = vector.broadcast %cst_7 : f32 to vector<8x128xf32>
    %12 = arith.addf %11, %10 : vector<8x128xf32>
    %13 = arith.mulf %7, %12 : vector<8x128xf32>
    %14 = arith.truncf %13 : vector<8x128xf32> to vector<8x128xbf16>
    %c0_8 = arith.constant 0 : index
    %c0_9 = arith.constant 0 : index
    %15 = vector.load %arg4[%c0_8, %c0_9] : memref<128x128xbf16, #tpu.memory_space<vmem>>, vector<128x128xbf16>
    %cst_10 = arith.constant dense<0.000000e+00> : vector<8x128xf32>
    %16 = tpu.matmul %14, %15, %cst_10 {dimension_numbers = #tpu.dot_dimension_numbers<[1], [0], [0], [1], [0, 0, 1, 1], [], []>} : vector<8x128xbf16>, vector<128x128xbf16>, vector<8x128xf32> -> vector<8x128xf32>
    %c0_11 = arith.constant 0 : index
    %c0_12 = arith.constant 0 : index
    %17 = vector.load %arg5[%c0_11, %c0_12] : memref<1x128xf32, #tpu.memory_space<vmem>>, vector<1x128xf32>
    %18 = vector.broadcast %17 : vector<1x128xf32> to vector<8x128xf32>
    %19 = arith.addf %16, %18 : vector<8x128xf32>
    %cst_13 = arith.constant 5.000000e-01 : f32
    %20 = vector.broadcast %cst_13 : f32 to vector<8x128xf32>
    %21 = arith.mulf %20, %19 : vector<8x128xf32>
    %cst_14 = arith.constant 0.707106769 : f32
    %22 = vector.broadcast %cst_14 : f32 to vector<8x128xf32>
    %23 = arith.mulf %19, %22 : vector<8x128xf32>
    %24 = math.erf %23 : vector<8x128xf32>
    %cst_15 = arith.constant 1.000000e+00 : f32
    %25 = vector.broadcast %cst_15 : f32 to vector<8x128xf32>
    %26 = arith.addf %25, %24 : vector<8x128xf32>
    %27 = arith.mulf %21, %26 : vector<8x128xf32>
    %28 = arith.truncf %27 : vector<8x128xf32> to vector<8x128xbf16>
    %c0_16 = arith.constant 0 : index
    %c0_17 = arith.constant 0 : index
    %29 = vector.load %arg6[%c0_16, %c0_17] : memref<128x128xbf16, #tpu.memory_space<vmem>>, vector<128x128xbf16>
    %cst_18 = arith.constant dense<0.000000e+00> : vector<8x128xf32>
    %30 = tpu.matmul %28, %29, %cst_18 {dimension_numbers = #tpu.dot_dimension_numbers<[1], [0], [0], [1], [0, 0, 1, 1], [], []>} : vector<8x128xbf16>, vector<128x128xbf16>, vector<8x128xf32> -> vector<8x128xf32>
    %c0_19 = arith.constant 0 : index
    %c0_20 = arith.constant 0 : index
    %31 = vector.load %arg7[%c0_19, %c0_20] : memref<1x128xf32, #tpu.memory_space<vmem>>, vector<1x128xf32>
    %32 = vector.broadcast %31 : vector<1x128xf32> to vector<8x128xf32>
    %33 = arith.addf %30, %32 : vector<8x128xf32>
    %cst_21 = arith.constant 5.000000e-01 : f32
    %34 = vector.broadcast %cst_21 : f32 to vector<8x128xf32>
    %35 = arith.mulf %34, %33 : vector<8x128xf32>
    %cst_22 = arith.constant 0.707106769 : f32
    %36 = vector.broadcast %cst_22 : f32 to vector<8x128xf32>
    %37 = arith.mulf %33, %36 : vector<8x128xf32>
    %38 = math.erf %37 : vector<8x128xf32>
    %cst_23 = arith.constant 1.000000e+00 : f32
    %39 = vector.broadcast %cst_23 : f32 to vector<8x128xf32>
    %40 = arith.addf %39, %38 : vector<8x128xf32>
    %41 = arith.mulf %35, %40 : vector<8x128xf32>
    %c0_24 = arith.constant 0 : index
    %c0_25 = arith.constant 0 : index
    %42 = vector.load %arg8[%c0_24, %c0_25] : memref<8x128xf32, #tpu.memory_space<vmem>>, vector<8x128xf32>
    tpu.vector_store %arg8[%c0_24, %c0_25], %41 {strides = array<i32>} : memref<8x128xf32, #tpu.memory_space<vmem>>, vector<8x128xf32>,
    return
  }
  func.func @transform_0(%arg0: i32) -> (i32, i32) {
    %c0_i32 = arith.constant 0 : i32
    %c0_i32_0 = arith.constant 0 : i32
    return %arg0, %c0_i32 : i32, i32
  }
  func.func @transform_1(%arg0: i32) -> (i32, i32) {
    %c0_i32 = arith.constant 0 : i32
    %c0_i32_0 = arith.constant 0 : i32
    %c0_i32_1 = arith.constant 0 : i32
    return %c0_i32, %c0_i32_0 : i32, i32
  }
  func.func @transform_2(%arg0: i32) -> (i32, i32) {
    %c0_i32 = arith.constant 0 : i32
    %c0_i32_0 = arith.constant 0 : i32
    %c0_i32_1 = arith.constant 0 : i32
    return %c0_i32, %c0_i32_0 : i32, i32
  }
  func.func @transform_3(%arg0: i32) -> (i32, i32) {
    %c0_i32 = arith.constant 0 : i32
    %c0_i32_0 = arith.constant 0 : i32
    %c0_i32_1 = arith.constant 0 : i32
    return %c0_i32, %c0_i32_0 : i32, i32
  }
  func.func @transform_4(%arg0: i32) -> (i32, i32) {
    %c0_i32 = arith.constant 0 : i32
    %c0_i32_0 = arith.constant 0 : i32
    %c0_i32_1 = arith.constant 0 : i32
    return %c0_i32, %c0_i32_0 : i32, i32
  }
  func.func @transform_5(%arg0: i32) -> (i32, i32) {
    %c0_i32 = arith.constant 0 : i32
    %c0_i32_0 = arith.constant 0 : i32
    %c0_i32_1 = arith.constant 0 : i32
    return %c0_i32, %c0_i32_0 : i32, i32
  }
  func.func @transform_6(%arg0: i32) -> (i32, i32) {
    %c0_i32 = arith.constant 0 : i32
    %c0_i32_0 = arith.constant 0 : i32
    %c0_i32_1 = arith.constant 0 : i32
    return %c0_i32, %c0_i32_0 : i32, i32
  }
  func.func @transform_7(%arg0: i32) -> (i32, i32) {
    %c0_i32 = arith.constant 0 : i32
    %c0_i32_0 = arith.constant 0 : i32
    return %arg0, %c0_i32 : i32, i32
  }
}

</mosaic_0001>

<bundles_post_ra>
// kernel: mlp_forward.1
= control target key start
LH: loop header
LB: loop body
LE: loop exit
PB: predicated region body
PF: predicated region fallthrough
CT: control target
= control target key end

     0   :  { %v563_v1 = vmov 0.0   ;;  %vm564_vm0 = vmmov 0   ;;  %s723_s0 = inlined_call_operand.vmem [shape: bf16[8,128], index: 0, kind: input, shape index: {}]   ;;  %s724_s1 = inlined_call_operand.vmem [shape: bf16[128,128], index: 1, kind: input, shape index: {}]   ;;  %s725_s2 = inlined_call_operand.vmem [shape: f32[1,128], index: 2, kind: input, shape index: {}]   ;;  %s726_s3 = inlined_call_operand.vmem [shape: bf16[128,128], index: 3, kind: input, shape index: {}]   ;;  %s727_s4 = inlined_call_operand.vmem [shape: f32[1,128], index: 4, kind: input, shape index: {}]   ;;  %s728_s5 = inlined_call_operand.vmem [shape: bf16[128,128], index: 5, kind: input, shape index: {}]   ;;  %s729_s6 = inlined_call_operand.vmem [shape: f32[1,128], index: 6, kind: input, shape index: {}]   ;;  %s730_s7 = inlined_call_operand.hbm [shape: f32[8,128], index: 7, kind: output, shape index: {}]  }
   0x1   :  { %v511_v0 = vld [vmem:[%s724_s1 + $0x38] sm:$0xff]   ;;  %448 = vmatprep.subr.bf16.mxu0 %v563_v1  ;;  %468 = vmatprep.subr.bf16.mxu1 %v563_v1  ;;  %v512_v2 = vld [vmem:[%s724_s1 + $0x30] sm:$0xff]   ;;  %v513_v3 = vld [vmem:[%s724_s1 + $0x28] sm:$0xff]  }
   0x2   :  { %449 = vmatpush3.bf16.msra.mxu0 %v511_v0  ;;  %464 = vmatprep.mubr.msk.bf16.mxu0 %vm564_vm0, %v563_v1  ;;  %v519_v4 = vld [vmem:[%s726_s3 + $0x38] sm:$0xff]   ;;  %v514_v5 = vld [vmem:[%s724_s1 + $0x20] sm:$0xff]   ;;  %v520_v6 = vld [vmem:[%s726_s3 + $0x30] sm:$0xff]  }
   0x3   :  { %450 = vmatprep.subr.bf16.mxu0 %v563_v1  ;;  %484 = vmatprep.mubr.msk.bf16.mxu1 %vm564_vm0, %v563_v1  ;;  %v515_v7 = vld [vmem:[%s724_s1 + $0x18] sm:$0xff]   ;;  %v516_v8 = vld [vmem:[%s724_s1 + $0x10] sm:$0xff]  }
   0x4   :  { %469 = vmatpush3.bf16.msra.mxu1 %v519_v4 }
   0x5   :  { %470 = vmatprep.subr.bf16.mxu1 %v563_v1 }
   0x6   :  { %451 = vmatpush3.bf16.msra.mxu0 %v512_v2 }
   0x7   :  { %452 = vmatprep.subr.bf16.mxu0 %v563_v1 }
   0x8   :  { %471 = vmatpush3.bf16.msra.mxu1 %v520_v6 }
   0x9   :  { %472 = vmatprep.subr.bf16.mxu1 %v563_v1 }
   0xa   :  { %453 = vmatpush3.bf16.msra.mxu0 %v513_v3 }
   0xb   :  { %454 = vmatprep.subr.bf16.mxu0 %v563_v1 }
   0xe   :  { %455 = vmatpush3.bf16.msra.mxu0 %v514_v5 }
   0xf   :  { %456 = vmatprep.subr.bf16.mxu0 %v563_v1 }
  0x12   :  { %457 = vmatpush3.bf16.msra.mxu0 %v515_v7 }
  0x13   :  { %458 = vmatprep.subr.bf16.mxu0 %v563_v1 }
  0x14   :  { %12 = vsyncpa [#allocation3], 0  ;;  %v517_v9 = vld [vmem:[%s724_s1 + $0x8] sm:$0xff]   ;;  %v518_v10 = vld [vmem:[%s724_s1] sm:$0xff]  }
  0x15   :  { %v28_v11 = vld [vmem:[%s723_s0] sm:$0xf]  ;;  %v521_v12 = vld [vmem:[%s726_s3 + $0x28] sm:$0xff]   ;;  %v523_v14 = vld [vmem:[%s726_s3 + $0x18] sm:$0xff]  }
  0x16   :  { %459 = vmatpush3.bf16.msra.mxu0 %v516_v8  ;;  %473 = vmatpush3.bf16.msra.mxu1 %v521_v12  ;;  %v522_v13 = vld [vmem:[%s726_s3 + $0x20] sm:$0xff]   ;;  %v524_v15 = vld [vmem:[%s726_s3 + $0x10] sm:$0xff]   ;;  %v525_v16 = vld [vmem:[%s726_s3 + $0x8] sm:$0xff]  }
  0x17   :  { %460 = vmatprep.subr.bf16.mxu0 %v563_v1  ;;  %474 = vmatprep.subr.bf16.mxu1 %v563_v1  ;;  %v526_v17 = vld [vmem:[%s726_s3] sm:$0xff]   ;;  %v527_v18 = vld [vmem:[%s728_s5 + $0x38] sm:$0xff]   ;;  %v528_v19 = vld [vmem:[%s728_s5 + $0x30] sm:$0xff]  }
  0x18   :  { %v394_v20 = vld [vmem:[%s725_s2] ss:$0 sm:$0xff]  ;;  %v529_v32 = vld [vmem:[%s728_s5 + $0x28] sm:$0xff]   ;;  %v531_v34 = vld [vmem:[%s728_s5 + $0x18] sm:$0xff]  }
  0x19   :  { %v530_v33 = vld [vmem:[%s728_s5 + $0x20] sm:$0xff]   ;;  %v532_v35 = vld [vmem:[%s728_s5 + $0x10] sm:$0xff]   ;;  %v533_v36 = vld [vmem:[%s728_s5 + $0x8] sm:$0xff]  }
  0x1a   :  { %461 = vmatpush3.bf16.msra.mxu0 %v517_v9  ;;  %475 = vmatpush3.bf16.msra.mxu1 %v522_v13  ;;  %v534_v37 = vld [vmem:[%s728_s5] sm:$0xff]  }
  0x1b   :  { %462 = vmatprep.subr.bf16.mxu0 %v563_v1  ;;  %476 = vmatprep.subr.bf16.mxu1 %v563_v1  ;;  %v403_v38 = vld [vmem:[%s727_s4] ss:$0 sm:$0xff]  ;;  %s565_s4 = smov [#allocation2]  }
  0x1c   :  { %v412_v50 = vld [vmem:[%s729_s6] ss:$0 sm:$0xff]  ;;  %s386_s27 = sshll.u32 %s565_s4, 4  ;;  %s387_s27 = int_to_ptr.vmem [resolvable:$true] %s386_s27 }
  0x1d   :  { %s541_s28 = scalar_lea.vmem %s387_s27, 128  ;;  %p546_p1 = scmp.lt.s32.totalorder %s387_s27, %s387_s27 }
  0x1e   :  { %463 = vmatpush3.bf16.msra.mxu0 %v518_v10  ;;  %477 = vmatpush3.bf16.msra.mxu1 %v523_v14  ;;  %p542_p0 = scmp.ne.s32.totalorder %s387_s27, %s541_s28  ;;  %p547_p2 = scmp.lt.s32.totalorder %s541_s28, %s541_s28 }
  0x1f   :  { %488 = vmatprep.subr.bf16.mxu0 %v563_v1  ;;  %478 = vmatprep.subr.bf16.mxu1 %v563_v1 }
  0x20   :  { %p548_p3 = por %p547_p2, %p546_p1 }
  0x21   :  { %465 = vmatmul.mubr.bf16.vlgmr.msra.gmra.mxu0 %v28_v11 }
  0x22   :  { %504 = vmatprep.mubr.msk.bf16.mxu0 %vm564_vm0, %v563_v1  ;;  %479 = vmatpush3.bf16.msra.mxu1 %v524_v15  ;;  %p549_p4 = pnand %p548_p3, %p542_p0 }
  0x23   :  { %480 = vmatprep.subr.bf16.mxu1 %v563_v1  ;;  %489 = vmatpush3.bf16.msra.mxu0 %v527_v18 }
  0x24   :  { %490 = vmatprep.subr.bf16.mxu0 %v563_v1 }
  0x26   :  { %481 = vmatpush3.bf16.msra.mxu1 %v525_v16 }
  0x27   :  { %482 = vmatprep.subr.bf16.mxu1 %v563_v1  ;;  %491 = vmatpush3.bf16.msra.mxu0 %v528_v19 }
  0x28   :  { %492 = vmatprep.subr.bf16.mxu0 %v563_v1 }
  0x2a   :  { %483 = vmatpush3.bf16.msra.mxu1 %v526_v17 }
  0x2b   :  { %493 = vmatpush3.bf16.msra.mxu0 %v529_v32 }
  0x2c   :  { %494 = vmatprep.subr.bf16.mxu0 %v563_v1 }
  0x2f   :  { %495 = vmatpush3.bf16.msra.mxu0 %v530_v33 }
  0x30   :  { %496 = vmatprep.subr.bf16.mxu0 %v563_v1 }
  0x33   :  { %497 = vmatpush3.bf16.msra.mxu0 %v531_v34 }
  0x34   :  { %498 = vmatprep.subr.bf16.mxu0 %v563_v1 }
  0x37   :  { %499 = vmatpush3.bf16.msra.mxu0 %v532_v35 }
  0x38   :  { %500 = vmatprep.subr.bf16.mxu0 %v563_v1 }
  0x3b   :  { %501 = vmatpush3.bf16.msra.mxu0 %v533_v36 }
  0x3c   :  { %502 = vmatprep.subr.bf16.mxu0 %v563_v1 }
  0x3f   :  { %503 = vmatpush3.bf16.msra.mxu0 %v534_v37 }
  0xe1   :  { %v134_v21 = vpop.f32.mrf.mxu0 }
  0xe2   :  { %v135_v22 = vadd.f32 %v394_v20, %v134_v21 }
  0xe3   :  { %v466_v23 = vpop.f32.mrf.mxu0 }
  0xe4   :  { %v141_v24 = vmul.f32 0.70710677, %v135_v22  ;;  %v140_v28 = vmul.f32 0.5, %v135_v22 }
  0xe5   :  { %v137_v25 = vpop.f32.mrf.mxu0 }
  0xe6   :  { %535 = verf.f32 %v141_v24 }
  0xe7   :  { %v467_v26 = vpop.f32.mrf.mxu0 }
  0xf3   :  { %v536_v27 = vpop.eup %535 }
  0xf4   :  { %v143_v29 = vadd.f32 1.0, %v536_v27 }
  0xf6   :  { %v144_v30 = vmul.f32 %v143_v29, %v140_v28 }
  0xf8   :  { %v145_v31 = vpack.c.bf16 %v144_v30, %v144_v30 }
  0xfa   :  { %485 = vmatmul.mubr.bf16.vlgmr.msra.gmra.mxu1 %v145_v31 }
 0x1ba   :  { %v251_v39 = vpop.f32.mrf.mxu1 }
 0x1bb   :  { %v252_v40 = vadd.f32 %v403_v38, %v251_v39 }
 0x1bc   :  { %v486_v41 = vpop.f32.mrf.mxu1 }
 0x1bd   :  { %v258_v42 = vmul.f32 0.70710677, %v252_v40  ;;  %v257_v46 = vmul.f32 0.5, %v252_v40 }
 0x1be   :  { %v254_v43 = vpop.f32.mrf.mxu1 }
 0x1bf   :  { %537 = verf.f32 %v258_v42 }
 0x1c0   :  { %v487_v44 = vpop.f32.mrf.mxu1 }
 0x1cc   :  { %v538_v45 = vpop.eup %537 }
 0x1cd   :  { %v260_v47 = vadd.f32 1.0, %v538_v45 }
 0x1cf   :  { %v261_v48 = vmul.f32 %v260_v47, %v257_v46 }
 0x1d1   :  { %v262_v49 = vpack.c.bf16 %v261_v48, %v261_v48 }
 0x1d3   :  { %505 = vmatmul.mubr.bf16.vlgmr.msra.gmra.mxu0 %v262_v49 }
 0x293   :  { %v368_v51 = vpop.f32.mrf.mxu0 }
 0x294   :  { %v369_v52 = vadd.f32 %v412_v50, %v368_v51 }
 0x295   :  { %v506_v53 = vpop.f32.mrf.mxu0 }
 0x296   :  { %v375_v54 = vmul.f32 0.70710677, %v369_v52  ;;  %v374_v58 = vmul.f32 0.5, %v369_v52 }
 0x297   :  { %v371_v55 = vpop.f32.mrf.mxu0 }
 0x298   :  { %539 = verf.f32 %v375_v54 }
 0x299   :  { %v507_v56 = vpop.f32.mrf.mxu0 }
 0x2a5   :  { %v540_v57 = vpop.eup %539 }
 0x2a6   :  { %v377_v59 = vadd.f32 1.0, %v540_v57 }
 0x2a8   :  { %v378_v60 = vmul.f32 %v377_v59, %v374_v58 }
 0x2aa   :  { %379 = vst [vmem:[#allocation2] sm:$0xff] %v378_v60 }
 0x2ab   :  { %552 = shalt.err (!%p549_p4)
}
 0x2ac   :  { %389 = dma.vmem_to_hbm [thread:$0]  %s387_s27, 128, %s730_s7, [#allocation3]  }
 0x2ad   :  { %561 = dma.done.wait [#allocation3], 128  }
 0x2ae   :  { %562 = vsyncadd [#allocation3], 4294967168 }
 0x2af   :  { %393 = vsyncpa [#allocation3], 1 }

</bundles_post_ra>
